<compile_context>
chip_gen: v7x
topology: tpu7x:2x2x1
jax: 0.10.0
libtpu: 0.0.40
codegen_flags: <defaults>
</compile_context>

<pallas_src>
import functools

import jax
import jax.numpy as jnp
from jax.experimental import pallas as pl
from jax.experimental.pallas import tpu as pltpu

_LANE = 128     # vreg lane width (last dim)
_SUBLANE = 8    # f32/int32 sublane tile (second-to-last dim)


# -----------------------------------------------------------------------------
# Kernel
# -----------------------------------------------------------------------------
def _ramp_embedding_kernel(idx_ref, out_ref, *, v_min, inv_range):
    """out = clip((idx - v_min) * inv_range, 0, 1), elementwise on the VPU.

    idx_ref: (block_rows, 128) int32   lane-dense slab of indices
    out_ref: (block_rows, 128) float32 lane-dense slab of embedding values
    """
    x = idx_ref[...].astype(jnp.float32)
    out_ref[...] = jnp.clip((x - v_min) * inv_range, 0.0, 1.0)


def _round_up(x, m):
    return (x + m - 1) // m * m


# -----------------------------------------------------------------------------
# Wrapper
# -----------------------------------------------------------------------------
@functools.partial(
    jax.jit,
    static_argnames=("v_min", "v_max", "embedding_dim",
                     "max_block_rows", "min_pallas_elements"),
)
def custom_embedding_forward(indices, *, v_min=100, v_max=3000,
                             embedding_dim=1, max_block_rows=2048,
                             min_pallas_elements=1024):
    """Forward pass of CustomEmbedding.

    indices: integer array of any shape.
    Returns float32 array of shape indices.shape + (embedding_dim,).
    NOTE: out-of-range indices clamp to 0/1 instead of erroring like
    nn.Embedding (acceptable for the frozen ramp table).
    """
    orig_shape = indices.shape
    flat = indices.reshape(-1).astype(jnp.int32)   # reshape free; astype no-op for int32 input
    m = flat.shape[0]

    v_minf = float(v_min)
    inv_range = 1.0 / float(v_max - v_min)

    if m == 0:
        vals = jnp.zeros((0,), jnp.float32)
    elif m < min_pallas_elements:
        # Small-input fast path: a fused XLA clip beats a dedicated pallas_call
        # (and can fuse into the consumer, avoiding an HBM round-trip).
        vals = jnp.clip((flat.astype(jnp.float32) - v_minf) * inv_range, 0.0, 1.0)
    else:
        rows = pl.cdiv(m, _LANE)
        m_padded = rows * _LANE
        pad = m_padded - m
        if pad:
            # Only the <=127-element lane tail; no block-multiple round-up.
            flat = jnp.pad(flat, (0, pad))
        idx2d = flat.reshape(rows, _LANE)

        # Block choice: multiple of the 8-row sublane tile, capped at
        # max_block_rows, and — when there is enough work — at most rows/2 so
        # the "parallel" grid axis has >= 2 steps for v7x's two TensorCores.
        if rows <= _SUBLANE:
            block_rows = rows                      # full-extent block (allowed)
        else:
            half = _round_up(pl.cdiv(rows, 2), _SUBLANE)
            block_rows = min(max_block_rows, half)
        grid = (pl.cdiv(rows, block_rows),)        # ragged last block is masked

        # in + out, double-buffered. Only raise the scoped-VMEM limit if a
        # caller pushes blocks past v5e's 16 MiB default.
        est_vmem = 4 * block_rows * _LANE * 4
        vmem_limit = (min(est_vmem + (2 << 20), 64 << 20)
                      if est_vmem > (12 << 20) else None)

        kernel = functools.partial(_ramp_embedding_kernel,
                                   v_min=v_minf, inv_range=inv_range)

        vals2d = pl.pallas_call(
            kernel,
            out_shape=jax.ShapeDtypeStruct((rows, _LANE), jnp.float32),
            grid_spec=pltpu.PrefetchScalarGridSpec(
                num_scalar_prefetch=0,
                grid=grid,
                in_specs=[pl.BlockSpec((block_rows, _LANE), lambda i: (i, 0))],
                out_specs=pl.BlockSpec((block_rows, _LANE), lambda i: (i, 0)),
            ),
            compiler_params=pltpu.CompilerParams(
                dimension_semantics=("parallel",),
                vmem_limit_bytes=vmem_limit,
            ),
        )(idx2d)

        vals = vals2d.reshape(-1)
        if pad:
            vals = vals[:m]

    # Every column of the frozen table is the same ramp, so the embedding_dim
    # axis is a pure broadcast (kept lazy; it only costs HBM if the consumer
    # materializes it).
    out = vals.reshape(orig_shape + (1,))
    if embedding_dim != 1:
        out = jnp.broadcast_to(out, orig_shape + (embedding_dim,))
    return out


def make_custom_embedding_table(num_embeddings=4096, embedding_dim=1,
                                v_min=100, v_max=3000):
    """Deterministic table matching CustomEmbedding.initialize_weights
    (used only as the reference for the correctness check)."""
    assert 0 < v_min < v_max < num_embeddings
    row_ids = jnp.arange(num_embeddings, dtype=jnp.float32)
    col = jnp.clip((row_ids - v_min) / (v_max - v_min), 0.0, 1.0)
    return jnp.broadcast_to(col[:, None],
                            (num_embeddings, embedding_dim)).astype(jnp.float32)


# -----------------------------------------------------------------------------
# Test
# -----------------------------------------------------------------------------
if __name__ == "__main__":
    num_embeddings, embedding_dim = 4096, 1
    v_min, v_max = 100, 3000

    table = make_custom_embedding_table(num_embeddings, embedding_dim,
                                        v_min, v_max)

    key = jax.random.PRNGKey(0)
    k1, k2, k3 = jax.random.split(key, 3)

    # 1) Pallas path, lane-aligned, multi-step parallel grid
    #    (m=4096 -> rows=32, block_rows=16, grid=2).
    idx_a = jax.random.randint(k1, (4, 1024), 0, num_embeddings, dtype=jnp.int32)
    out_a = jax.block_until_ready(
        custom_embedding_forward(idx_a, v_min=v_min, v_max=v_max,
                                 embedding_dim=embedding_dim))
    ref_a = jnp.take(table, idx_a.reshape(-1), axis=0).reshape(
        idx_a.shape + (embedding_dim,))
    assert out_a.shape == (4, 1024, 1), out_a.shape
    assert out_a.dtype == jnp.float32
    assert jnp.allclose(out_a, ref_a, atol=1e-6), "mismatch (lane-aligned)"

    # 2) Pallas path with a ragged lane tail (m=2000 -> pad to 2048, rows=16,
    #    block_rows=8, grid=2; exercises the tail pad + ragged handling).
    idx_b = jax.random.randint(k2, (4, 500), 0, num_embeddings, dtype=jnp.int32)
    out_b = jax.block_until_ready(
        custom_embedding_forward(idx_b, v_min=v_min, v_max=v_max,
                                 embedding_dim=embedding_dim))
    ref_b = jnp.take(table, idx_b.reshape(-1), axis=0).reshape(
        idx_b.shape + (embedding_dim,))
    assert out_b.shape == (4, 500, 1)
    assert jnp.allclose(out_b, ref_b, atol=1e-6), "mismatch (ragged tail)"

    # 3) Small-input fast path (skips pallas_call, fused XLA clip).
    idx_c = jax.random.randint(k3, (2, 8), 0, num_embeddings, dtype=jnp.int32)
    out_c = jax.block_until_ready(
        custom_embedding_forward(idx_c, v_min=v_min, v_max=v_max,
                                 embedding_dim=embedding_dim))
    ref_c = jnp.take(table, idx_c.reshape(-1), axis=0).reshape(
        idx_c.shape + (embedding_dim,))
    assert out_c.shape == (2, 8, 1)
    assert jnp.allclose(out_c, ref_c, atol=1e-6), "mismatch (fast path)"

    # 4) embedding_dim > 1: every column of the frozen table is the same ramp.
    table4 = make_custom_embedding_table(num_embeddings, 4, v_min, v_max)
    out_d = jax.block_until_ready(
        custom_embedding_forward(idx_a, v_min=v_min, v_max=v_max,
                                 embedding_dim=4))
    ref_d = jnp.take(table4, idx_a.reshape(-1), axis=0).reshape(
        idx_a.shape + (4,))
    assert out_d.shape == (4, 1024, 4)
    assert jnp.allclose(out_d, ref_d, atol=1e-6), "mismatch (embedding_dim=4)"

    print("KERNEL_OK")
</pallas_src>

<mosaic_0001>
module attributes {stable_mosaic.version = 11 : i64} {
  func.func @_ramp_embedding_kernel(%arg0: i32, %arg1: memref<16x128xi32, #tpu.memory_space<vmem>>, %arg2: memref<16x128xf32, #tpu.memory_space<vmem>>) attributes {dimension_semantics = [#tpu.dimension_semantics<parallel>], iteration_bounds = array<i64: 2>, scalar_prefetch = 0 : i64, scratch_operands = 0 : i64, tpu.core_type = #tpu.core_type<tc>, window_params = [{transform_indices = @transform_0, window_bounds = array<i64: 16, 128>}, {transform_indices = @transform_1, window_bounds = array<i64: 16, 128>}]} {
    %c0 = arith.constant 0 : index
    %c0_0 = arith.constant 0 : index
    %0 = vector.load %arg1[%c0, %c0_0] : memref<16x128xi32, #tpu.memory_space<vmem>>, vector<16x128xi32>
    %1 = arith.sitofp %0 : vector<16x128xi32> to vector<16x128xf32>
    %cst = arith.constant 1.000000e+02 : f32
    %2 = vector.broadcast %cst : f32 to vector<16x128xf32>
    %3 = arith.subf %1, %2 : vector<16x128xf32>
    %cst_1 = arith.constant 3.44827597E-4 : f32
    %4 = vector.broadcast %cst_1 : f32 to vector<16x128xf32>
    %5 = arith.mulf %3, %4 : vector<16x128xf32>
    %cst_2 = arith.constant 0.000000e+00 : f32
    %cst_3 = arith.constant 1.000000e+00 : f32
    %6 = vector.broadcast %cst_2 : f32 to vector<16x128xf32>
    %7 = arith.maximumf %6, %5 : vector<16x128xf32>
    %8 = vector.broadcast %cst_3 : f32 to vector<16x128xf32>
    %9 = arith.minimumf %8, %7 : vector<16x128xf32>
    %c0_4 = arith.constant 0 : index
    %c0_5 = arith.constant 0 : index
    %10 = vector.load %arg2[%c0_4, %c0_5] : memref<16x128xf32, #tpu.memory_space<vmem>>, vector<16x128xf32>
    tpu.vector_store %arg2[%c0_4, %c0_5], %9 {strides = array<i32>} : memref<16x128xf32, #tpu.memory_space<vmem>>, vector<16x128xf32>,
    return
  }
  func.func @transform_0(%arg0: i32) -> (i32, i32) {
    %c0_i32 = arith.constant 0 : i32
    %c0_i32_0 = arith.constant 0 : i32
    return %arg0, %c0_i32 : i32, i32
  }
  func.func @transform_1(%arg0: i32) -> (i32, i32) {
    %c0_i32 = arith.constant 0 : i32
    %c0_i32_0 = arith.constant 0 : i32
    return %arg0, %c0_i32 : i32, i32
  }
}

</mosaic_0001>

<bundles_post_ra>
// kernel: custom_embedding_forward.1
= control target key start
LH: loop header
LB: loop body
LE: loop exit
PB: predicated region body
PF: predicated region fallthrough
CT: control target
= control target key end

     0   :  { %6 = vsyncpa [#allocation3], 0  ;;  %s443_s0 = inlined_call_operand.vmem [shape: s32[32,128], index: 0, kind: input, shape index: {}]   ;;  %s444_s1 = inlined_call_operand.hbm [shape: f32[32,128], index: 1, kind: output, shape index: {}]  }
   0x1   :  { %8 = vsyncpa [#allocation3 + $0x1], 0  ;;  %s341_s6 = smov 0   ;;  %s343_s7 = smov 0  }
   0x2   :  { %s345_s8 = smov 0   ;;  %s347_s9 = smov 0  }
   0x3 LB: > { %s362_s10 = sadd.s32 4294967295, %s326_s9   ;;  %s208_s11 = sadd.s32 4294967294, %s326_s9   ;;  %s326_s9 = sphi %s347_s9, %s450_s9   ;;  %s322_s8 = sphi %s345_s8, %s449_s8   ;;  %s318_s7 = sphi %s343_s7, %s448_s7   ;;  %s314_s6 = sphi %s341_s6, %s447_s6  }
   0x4   : > { %s366_s12 = sadd.s32 1, %s326_s9   ;;  %s47_s13 = sadd.s32 1, %s322_s8 }
   0x5   : > { %s44_s14 = ssub.s32 %s326_s9, %s366_s12  ;;  %p57_p0 = scmp.ne.s32.totalorder %s322_s8, %s318_s7 }
   0x6   : > { %p45_p1 = scmp.eq.s32.totalorder %s44_s14, 0  ;;  %p58_p2 = scmp.eq.s32.totalorder %s362_s10, 1 }
   0x7   : > { %p63_p3 = scmp.ne.s32.totalorder %s318_s7, %s314_s6  ;;  %p64_p4 = scmp.eq.s32.totalorder %s208_s11, 1 }
   0x8   : > { %s377_s15 = scalar_select %p45_p1, %s322_s8, %s47_s13  }
   0x9   : > { %p379_p5 = por %p58_p2, %p57_p0  ;;  %p383_p6 = por %p64_p4, %p63_p3 }
   0xa   : > { %p211_p7 = scmp.ge.s32.totalorder %s326_s9, 1  ;;  %p91_p8 = scmp.lt.s32.totalorder %s326_s9, 3 }
   0xc   : > { %p92_p9 = pnand %p211_p7, %p91_p8 }
   0xd   : > { %s213_s18 = sshll.u32 (!%p92_p9), %s362_s10, 1  ;;  %s108_s19 = sand.u32 (!%p92_p9), 1, %s318_s7  }
   0xe   : > { %95 = sbr.rel (%p92_p9) target bundleno = 50 (0x32), region = 24  ;;  %p112_p10 = scmp.lt.s32.totalorder (!%p92_p9), %s213_s18, 3 }
   0xf   : > { %s212_s21 = sshll.u32 (!%p92_p9), %s108_s19, 4  ;;  %s222_s27 = sshll.u32 (!%p92_p9), %s362_s10, 8 }
  0x10   : > { %s110_s25 = scalar_lea.vmem (!%p92_p9), [#allocation2], %s212_s21  ;;  %s400_s30 = scalar_lea.hbm (!%p92_p9), %s444_s1, %s222_s27 }
  0x11   : > { %s146_s26 = sshll.u32 (!%p92_p9), %s110_s25, 4  ;;  %s402_s2 = scalar_lea.sflag (!%p92_p9), [#allocation3], %s108_s19  ;;  %s395_s26 = int_to_ptr.vmem [resolvable:$true] %s146_s26 }
  0x12   : > { %s264_s3 = scalar_lea.vmem (!%p92_p9), %s395_s26, 256  ;;  %s328_s4 = smov (!%p92_p9), [#allocation2]  }
  0x13   : > { %p265_p11 = scmp.ne.s32.totalorder (!%p92_p9), %s395_s26, %s264_s3  ;;  %s268_s5 = sshll.u32 (!%p92_p9), %s328_s4, 4  ;;  %s269_s5 = int_to_ptr.vmem [resolvable:$false] %s268_s5 }
  0x14   : > { %s270_s10 = scalar_lea.vmem (!%p92_p9), %s269_s5, 512  ;;  %p271_p0 = scmp.lt.s32.totalorder (!%p92_p9), %s395_s26, %s269_s5 }
  0x15   : > { %s452_s18 = smov (!%p112_p10, %s213_s18), 3  ;;  %p266_p12 = pnand %p265_p11, %p379_p5 }
  0x16   : > { %s214_s20 = sshll.u32 %s452_s18, 3  ;;  %p272_p1 = scmp.lt.s32.totalorder %s270_s10, %s264_s3 }
  0x17   : > { %s115_s24 = scalar_lea.vmem %s443_s0, %s214_s20  ;;  %p267_p13 = pneg %p266_p12 }
  0x18   : > { %v118_v0 = vld [vmem:[%s115_s24] sm:$0xff]  ;;  %v119_v1 = vld [vmem:[%s115_s24 + $0x8] sm:$0xff]  ;;  %p273_p2 = por %p272_p1, %p271_p0 }
  0x19   : > { %v120_v2 = vcvt.s32.f32 %v118_v0  ;;  %v121_v3 = vcvt.s32.f32 %v119_v1 }
  0x1a   : > { %p274_p3 = pnand %p273_p2, %p267_p13 }
  0x1b   : > { %v215_v4 = vadd.f32 -100.0, %v120_v2  ;;  %v216_v5 = vadd.f32 -100.0, %v121_v3 }
  0x1d   : > { %v124_v6 = vmul.f32 0.0003448276, %v215_v4  ;;  %v125_v7 = vmul.f32 0.0003448276, %v216_v5 }
  0x1f   : > { %v126_v8 = vmax.f32 %v124_v6, 0.0  ;;  %v127_v9 = vmax.f32 %v125_v7, 0.0 }
  0x21   : > { %v128_v10 = vmin.f32 %v126_v8, 1.0  ;;  %v129_v11 = vmin.f32 %v127_v9, 1.0 }
  0x23   : > { %130 = vst [vmem:[%s110_s25] sm:$0xff] %v128_v10  ;;  %131 = vst [vmem:[%s110_s25 + $0x8] sm:$0xff] %v129_v11 }
  0x24   : > { %277 = shalt.err (!%p274_p3)
}
  0x25   : > { %s278_s11 = scalar_lea.hbm %s400_s30, 256  ;;  %s282_s18 = scalar_lea.hbm %s444_s1, 512 }
  0x26   : > { %p279_p4 = scmp.ne.s32.totalorder %s400_s30, %s278_s11  ;;  %p283_p9 = scmp.lt.u32.totalorder %s400_s30, %s444_s1 }
  0x27   : > { %p284_p10 = scmp.lt.u32.totalorder %s282_s18, %s278_s11  ;;  %p286_p12 = scmp.lt.u32.totalorder %s278_s11, %s400_s30 }
  0x28   : > { %p280_p7 = pnand %p279_p4, %p379_p5 }
  0x29   : > { %p285_p11 = por %p284_p10, %p283_p9 }
  0x2a   : > { %p281_p8 = pneg %p280_p7 }
  0x2b   : > { %p287_p13 = por %p286_p12, %p285_p11 }
  0x2d   : > { %p288_p0 = pnand %p287_p13, %p281_p8 }
  0x2f   : > { %291 = shalt.err (!%p288_p0)
}
  0x30   : > { %s329_s21 = smov 128   ;;  %s330_s22 = smov 8  }
  0x31   : > { %223 = dma.vmem_to_hbm [thread:$0]  (%p379_p5), %s395_s26, 256, %s400_s30, %s402_s2, %s329_s21, %s329_s21, %s330_s22  }
  0x32 PF: > { %p229_p1 = scmp.ge.s32.totalorder %s326_s9, 2  ;;  %s161_s23 = sand.u32 1, %s314_s6  }
  0x33   : > { %s162_s24 = scalar_lea.sflag [#allocation3], %s161_s23 }
  0x34   : > { %p226_p2 = pnand %p229_p1, %p383_p6 }
  0x36   : > { %309 = dma.done.wait (!%p226_p2), %s162_s24, 256  }
  0x37   : > { %311 = vsyncadd (!%p226_p2), %s162_s24, 4294967040  ;;  %p11_p3 = scmp.ge.s32.totalorder %s366_s12, 4   ;;  %s447_s6 = smov %s318_s7 }
  0x38   : > { %s448_s7 = smov %s322_s8  ;;  %s449_s8 = smov %s377_s15 }
  0x39   : > { %s450_s9 = smov %s366_s12  ;;  %13 = sbr.rel (!%p11_p3) target bundleno = 3 (0x3), region = 59 }
  0x40   :  { %167 = vsyncpa [#allocation3], 1 }
  0x41   :  { %169 = vsyncpa [#allocation3 + $0x1], 1 }

</bundles_post_ra>
